<compile_context>
chip_gen: v7x
topology: tpu7x:2x2x1
jax: 0.10.0
libtpu: 0.0.40
codegen_flags: <defaults>
</compile_context>

<pallas_src>
import numpy as np
import jax
import jax.numpy as jnp
from jax.experimental import pallas as pl
from jax.experimental.pallas import tpu as pltpu

NEG_SLOPE = 0.01          # nn.LeakyReLU default negative_slope
H1, H2 = 600, 300         # hidden sizes from the PyTorch module
LANE = 128
SUBLANE = 8
MAX_TB = 512              # batch tile (amortizes ~0.35us/grid-step overhead)


def _round_up(x, m):
    return ((x + m - 1) // m) * m


def _leaky_relu(x):
    return jnp.where(x > 0, x, NEG_SLOPE * x)


def actor_kernel(x_ref, w1_ref, b1_ref, w2_ref, b2_ref, w3_ref, b3_ref, o_ref):
    """One batch tile: three fused (matmul + bias + activation) layers."""
    x = x_ref[...]
    # Layer 1: Linear(n_states, 600) + LeakyReLU  (bf16 into MXU, f32 accum)
    h = jnp.dot(x.astype(w1_ref.dtype), w1_ref[...],
                preferred_element_type=jnp.float32)
    h = _leaky_relu(h + b1_ref[...])
    # Layer 2: Linear(600, 300) + LeakyReLU
    h = jnp.dot(h.astype(w2_ref.dtype), w2_ref[...],
                preferred_element_type=jnp.float32)
    h = _leaky_relu(h + b2_ref[...])
    # Layer 3: Linear(300, n_actions) + Tanh (lane-padded to 128)
    h = jnp.dot(h.astype(w3_ref.dtype), w3_ref[...],
                preferred_element_type=jnp.float32)
    o_ref[...] = jnp.tanh(h + b3_ref[...])


def init_params(key, n_states, n_actions, init_w=0.0001):
    """Logical (unpadded) params mirroring ActorNetwork.init_weights.

    PyTorch weight shape is (out, in); fanin_init uses fanin = size[0] = out.
    Weights are stored transposed as (in, out) for row-major MXU matmuls.
    """
    k = jax.random.split(key, 6)

    def uniform(key, shape, bound):
        return jax.random.uniform(key, shape, jnp.float32, -bound, bound)

    w1 = uniform(k[0], (n_states, H1), 1.0 / np.sqrt(H1))
    b1 = uniform(k[1], (1, H1), 1.0 / np.sqrt(n_states))
    w2 = uniform(k[2], (H1, H2), 1.0 / np.sqrt(H2))
    b2 = uniform(k[3], (1, H2), 1.0 / np.sqrt(H1))
    w3 = uniform(k[4], (H2, n_actions), init_w)
    b3 = uniform(k[5], (1, n_actions), 1.0 / np.sqrt(H2))
    return {"w1": w1, "b1": b1, "w2": w2, "b2": b2, "w3": w3, "b3": b3}


def prepare_params(params, weights_dtype=jnp.bfloat16):
    """Zero-pad feature dims to multiples of 128 lanes; cast weights to bf16.

    Padding with zeros is exact: padded hidden columns stay 0 through
    LeakyReLU and contribute nothing downstream; padded action columns are
    tanh(0)=0 and sliced off by the wrapper.
    """
    n_states = params["w1"].shape[0]
    n_actions = params["w3"].shape[1]
    h1p = _round_up(H1, LANE)          # 640
    h2p = _round_up(H2, LANE)          # 384
    ap = _round_up(n_actions, LANE)    # >= 128 -> lane-dense output stores

    def pad2(a, rows, cols):
        return jnp.pad(a, ((0, rows - a.shape[0]), (0, cols - a.shape[1])))

    return {
        "w1": pad2(params["w1"], n_states, h1p).astype(weights_dtype),
        "b1": pad2(params["b1"], 1, h1p).astype(jnp.float32),
        "w2": pad2(params["w2"], h1p, h2p).astype(weights_dtype),
        "b2": pad2(params["b2"], 1, h2p).astype(jnp.float32),
        "w3": pad2(params["w3"], h2p, ap).astype(weights_dtype),
        "b3": pad2(params["b3"], 1, ap).astype(jnp.float32),
    }


def actor_forward(state, p, n_actions):
    """state: (B, n_states) f32. p: padded params from prepare_params."""
    B, n_states = state.shape
    h1p = p["w1"].shape[1]
    h2p = p["w2"].shape[1]
    ap = p["w3"].shape[1]

    # Batch tile: big enough to amortize per-step overhead, pipelined via grid.
    tb = min(MAX_TB, _round_up(max(B, 1), SUBLANE))
    bp = _round_up(B, tb)
    if bp != B:
        state = jnp.pad(state, ((0, bp - B), (0, 0)))
    grid = (bp // tb,)

    # Right-size the VMEM request (weights resident + double-buffered io +
    # per-tile hidden activations), with 2x headroom. Never claim all of v7x's
    # 64 MiB physical VMEM.
    wbytes = p["w1"].dtype.itemsize
    weight_bytes = (n_states * h1p + h1p * h2p + h2p * ap) * wbytes
    bias_bytes = (h1p + h2p + ap) * 4
    io_bytes = 2 * tb * (n_states + ap) * 4            # double-buffered x/out
    hidden_bytes = tb * (h1p + h2p) * 4                # layer intermediates
    vmem_need = weight_bytes + bias_bytes + io_bytes + hidden_bytes
    vmem_limit = int(min(max(2 * vmem_need, 8 << 20), 32 << 20))

    cost = pl.CostEstimate(
        flops=2 * bp * (n_states * h1p + h1p * h2p + h2p * ap),
        transcendentals=bp * ap,                       # tanh
        bytes_accessed=weight_bytes + bias_bytes
        + bp * n_states * 4 + bp * ap * 4,
    )

    def const_spec(shape):
        # Whole-array block, same for every grid step -> stays VMEM resident.
        return pl.BlockSpec(shape, lambda i: (0, 0))

    out_pad = pl.pallas_call(
        actor_kernel,
        out_shape=jax.ShapeDtypeStruct((bp, ap), jnp.float32),
        grid=grid,
        in_specs=[
            pl.BlockSpec((tb, n_states), lambda i: (i, 0)),   # x tile
            const_spec(p["w1"].shape), const_spec(p["b1"].shape),
            const_spec(p["w2"].shape), const_spec(p["b2"].shape),
            const_spec(p["w3"].shape), const_spec(p["b3"].shape),
        ],
        out_specs=pl.BlockSpec((tb, ap), lambda i: (i, 0)),
        compiler_params=pltpu.CompilerParams(
            dimension_semantics=("parallel",),   # shard batch across TCs (v7x)
            vmem_limit_bytes=vmem_limit,
        ),
        cost_estimate=cost,
    )(state, p["w1"], p["b1"], p["w2"], p["b2"], p["w3"], p["b3"])

    return out_pad[:B, :n_actions]


def actor_forward_ref(state, p):
    """Pure-JAX f32 reference on the unpadded params."""
    h = state @ p["w1"] + p["b1"]
    h = jnp.where(h > 0, h, NEG_SLOPE * h)
    h = h @ p["w2"] + p["b2"]
    h = jnp.where(h > 0, h, NEG_SLOPE * h)
    return jnp.tanh(h @ p["w3"] + p["b3"])


if __name__ == "__main__":
    key = jax.random.PRNGKey(0)
    k_param, k_state = jax.random.split(key)

    batch, n_states, n_actions = 2, 8, 4
    params = init_params(k_param, n_states, n_actions)
    prepared = prepare_params(params, weights_dtype=jnp.bfloat16)
    state = jax.random.normal(k_state, (batch, n_states), jnp.float32)

    out = actor_forward(state, prepared, n_actions)
    out = jax.block_until_ready(out)

    ref = actor_forward_ref(state, params)
    # Looser tolerance than pure-f32 because weights feed the MXU as bf16.
    np.testing.assert_allclose(np.asarray(out), np.asarray(ref),
                               rtol=2e-2, atol=2e-3)
    print("KERNEL_OK")
</pallas_src>

<mosaic_0001>
module attributes {stable_mosaic.version = 11 : i64} {
  func.func @actor_kernel(%arg0: i32, %arg1: memref<8x8xf32, #tpu.memory_space<vmem>>, %arg2: memref<8x640xbf16, #tpu.memory_space<vmem>>, %arg3: memref<1x640xf32, #tpu.memory_space<vmem>>, %arg4: memref<640x384xbf16, #tpu.memory_space<vmem>>, %arg5: memref<1x384xf32, #tpu.memory_space<vmem>>, %arg6: memref<384x128xbf16, #tpu.memory_space<vmem>>, %arg7: memref<1x128xf32, #tpu.memory_space<vmem>>, %arg8: memref<8x128xf32, #tpu.memory_space<vmem>>) attributes {dimension_semantics = [#tpu.dimension_semantics<parallel>], iteration_bounds = array<i64: 1>, scalar_prefetch = 0 : i64, scratch_operands = 0 : i64, tpu.core_type = #tpu.core_type<tc>, window_params = [{transform_indices = @transform_0, window_bounds = array<i64: 8, 8>}, {pipeline_mode = #tpu.pipeline_mode<synchronous>, transform_indices = @transform_1, window_bounds = array<i64: 8, 640>}, {pipeline_mode = #tpu.pipeline_mode<synchronous>, transform_indices = @transform_2, window_bounds = array<i64: 1, 640>}, {pipeline_mode = #tpu.pipeline_mode<synchronous>, transform_indices = @transform_3, window_bounds = array<i64: 640, 384>}, {pipeline_mode = #tpu.pipeline_mode<synchronous>, transform_indices = @transform_4, window_bounds = array<i64: 1, 384>}, {pipeline_mode = #tpu.pipeline_mode<synchronous>, transform_indices = @transform_5, window_bounds = array<i64: 384, 128>}, {pipeline_mode = #tpu.pipeline_mode<synchronous>, transform_indices = @transform_6, window_bounds = array<i64: 1, 128>}, {transform_indices = @transform_7, window_bounds = array<i64: 8, 128>}]} {
    %c0 = arith.constant 0 : index
    %c0_0 = arith.constant 0 : index
    %0 = vector.load %arg1[%c0, %c0_0] : memref<8x8xf32, #tpu.memory_space<vmem>>, vector<8x8xf32>
    %1 = arith.truncf %0 : vector<8x8xf32> to vector<8x8xbf16>
    %c0_1 = arith.constant 0 : index
    %c0_2 = arith.constant 0 : index
    %2 = vector.load %arg2[%c0_1, %c0_2] : memref<8x640xbf16, #tpu.memory_space<vmem>>, vector<8x640xbf16>
    %cst = arith.constant dense<0.000000e+00> : vector<8x640xf32>
    %3 = tpu.matmul %1, %2, %cst {dimension_numbers = #tpu.dot_dimension_numbers<[1], [0], [0], [1], [0, 0, 1, 1], [], []>} : vector<8x8xbf16>, vector<8x640xbf16>, vector<8x640xf32> -> vector<8x640xf32>
    %c0_3 = arith.constant 0 : index
    %c0_4 = arith.constant 0 : index
    %4 = vector.load %arg3[%c0_3, %c0_4] : memref<1x640xf32, #tpu.memory_space<vmem>>, vector<1x640xf32>
    %5 = vector.broadcast %4 : vector<1x640xf32> to vector<8x640xf32>
    %6 = arith.addf %3, %5 : vector<8x640xf32>
    %cst_5 = arith.constant 0.000000e+00 : f32
    %7 = vector.broadcast %cst_5 : f32 to vector<8x640xf32>
    %8 = arith.cmpf ogt, %6, %7 : vector<8x640xf32>
    %cst_6 = arith.constant 0.00999999977 : f32
    %9 = vector.broadcast %cst_6 : f32 to vector<8x640xf32>
    %10 = arith.mulf %9, %6 : vector<8x640xf32>
    %11 = arith.select %8, %6, %10 : vector<8x640xi1>, vector<8x640xf32>
    %12 = arith.truncf %11 : vector<8x640xf32> to vector<8x640xbf16>
    %c0_7 = arith.constant 0 : index
    %c0_8 = arith.constant 0 : index
    %13 = vector.load %arg4[%c0_7, %c0_8] : memref<640x384xbf16, #tpu.memory_space<vmem>>, vector<640x384xbf16>
    %cst_9 = arith.constant dense<0.000000e+00> : vector<8x384xf32>
    %14 = tpu.matmul %12, %13, %cst_9 {dimension_numbers = #tpu.dot_dimension_numbers<[1], [0], [0], [1], [0, 0, 1, 1], [], []>} : vector<8x640xbf16>, vector<640x384xbf16>, vector<8x384xf32> -> vector<8x384xf32>
    %c0_10 = arith.constant 0 : index
    %c0_11 = arith.constant 0 : index
    %15 = vector.load %arg5[%c0_10, %c0_11] : memref<1x384xf32, #tpu.memory_space<vmem>>, vector<1x384xf32>
    %16 = vector.broadcast %15 : vector<1x384xf32> to vector<8x384xf32>
    %17 = arith.addf %14, %16 : vector<8x384xf32>
    %cst_12 = arith.constant 0.000000e+00 : f32
    %18 = vector.broadcast %cst_12 : f32 to vector<8x384xf32>
    %19 = arith.cmpf ogt, %17, %18 : vector<8x384xf32>
    %cst_13 = arith.constant 0.00999999977 : f32
    %20 = vector.broadcast %cst_13 : f32 to vector<8x384xf32>
    %21 = arith.mulf %20, %17 : vector<8x384xf32>
    %22 = arith.select %19, %17, %21 : vector<8x384xi1>, vector<8x384xf32>
    %23 = arith.truncf %22 : vector<8x384xf32> to vector<8x384xbf16>
    %c0_14 = arith.constant 0 : index
    %c0_15 = arith.constant 0 : index
    %24 = vector.load %arg6[%c0_14, %c0_15] : memref<384x128xbf16, #tpu.memory_space<vmem>>, vector<384x128xbf16>
    %cst_16 = arith.constant dense<0.000000e+00> : vector<8x128xf32>
    %25 = tpu.matmul %23, %24, %cst_16 {dimension_numbers = #tpu.dot_dimension_numbers<[1], [0], [0], [1], [0, 0, 1, 1], [], []>} : vector<8x384xbf16>, vector<384x128xbf16>, vector<8x128xf32> -> vector<8x128xf32>
    %c0_17 = arith.constant 0 : index
    %c0_18 = arith.constant 0 : index
    %26 = vector.load %arg7[%c0_17, %c0_18] : memref<1x128xf32, #tpu.memory_space<vmem>>, vector<1x128xf32>
    %27 = vector.broadcast %26 : vector<1x128xf32> to vector<8x128xf32>
    %28 = arith.addf %25, %27 : vector<8x128xf32>
    %29 = math.tanh %28 : vector<8x128xf32>
    %c0_19 = arith.constant 0 : index
    %c0_20 = arith.constant 0 : index
    %30 = vector.load %arg8[%c0_19, %c0_20] : memref<8x128xf32, #tpu.memory_space<vmem>>, vector<8x128xf32>
    tpu.vector_store %arg8[%c0_19, %c0_20], %29 {strides = array<i32>} : memref<8x128xf32, #tpu.memory_space<vmem>>, vector<8x128xf32>,
    return
  }
  func.func @transform_0(%arg0: i32) -> (i32, i32) {
    %c0_i32 = arith.constant 0 : i32
    %c0_i32_0 = arith.constant 0 : i32
    return %arg0, %c0_i32 : i32, i32
  }
  func.func @transform_1(%arg0: i32) -> (i32, i32) {
    %c0_i32 = arith.constant 0 : i32
    %c0_i32_0 = arith.constant 0 : i32
    %c0_i32_1 = arith.constant 0 : i32
    return %c0_i32, %c0_i32_0 : i32, i32
  }
  func.func @transform_2(%arg0: i32) -> (i32, i32) {
    %c0_i32 = arith.constant 0 : i32
    %c0_i32_0 = arith.constant 0 : i32
    %c0_i32_1 = arith.constant 0 : i32
    return %c0_i32, %c0_i32_0 : i32, i32
  }
  func.func @transform_3(%arg0: i32) -> (i32, i32) {
    %c0_i32 = arith.constant 0 : i32
    %c0_i32_0 = arith.constant 0 : i32
    %c0_i32_1 = arith.constant 0 : i32
    return %c0_i32, %c0_i32_0 : i32, i32
  }
  func.func @transform_4(%arg0: i32) -> (i32, i32) {
    %c0_i32 = arith.constant 0 : i32
    %c0_i32_0 = arith.constant 0 : i32
    %c0_i32_1 = arith.constant 0 : i32
    return %c0_i32, %c0_i32_0 : i32, i32
  }
  func.func @transform_5(%arg0: i32) -> (i32, i32) {
    %c0_i32 = arith.constant 0 : i32
    %c0_i32_0 = arith.constant 0 : i32
    %c0_i32_1 = arith.constant 0 : i32
    return %c0_i32, %c0_i32_0 : i32, i32
  }
  func.func @transform_6(%arg0: i32) -> (i32, i32) {
    %c0_i32 = arith.constant 0 : i32
    %c0_i32_0 = arith.constant 0 : i32
    %c0_i32_1 = arith.constant 0 : i32
    return %c0_i32, %c0_i32_0 : i32, i32
  }
  func.func @transform_7(%arg0: i32) -> (i32, i32) {
    %c0_i32 = arith.constant 0 : i32
    %c0_i32_0 = arith.constant 0 : i32
    return %arg0, %c0_i32 : i32, i32
  }
}

</mosaic_0001>

<bundles_post_ra>
// kernel: tpu_custom_call.1
= control target key start
LH: loop header
LB: loop body
LE: loop exit
PB: predicated region body
PF: predicated region fallthrough
CT: control target
= control target key end

     0   :  { %12 = vsyncpa [#allocation3], 0  ;;  %s2465_s0 = inlined_call_operand.hbm [shape: f32[8,8], index: 0, kind: input, shape index: {}]   ;;  %s2466_s1 = inlined_call_operand.hbm [shape: bf16[8,640], index: 1, kind: input, shape index: {}]   ;;  %s2467_s2 = inlined_call_operand.vmem [shape: f32[1,640], index: 2, kind: input, shape index: {}]   ;;  %s2468_s3 = inlined_call_operand.hbm [shape: bf16[640,384], index: 3, kind: input, shape index: {}]   ;;  %s2469_s4 = inlined_call_operand.vmem [shape: f32[1,384], index: 4, kind: input, shape index: {}]   ;;  %s2470_s5 = inlined_call_operand.hbm [shape: bf16[384,128], index: 5, kind: input, shape index: {}]   ;;  %s2471_s6 = inlined_call_operand.vmem [shape: f32[1,128], index: 6, kind: input, shape index: {}]   ;;  %s2472_s7 = inlined_call_operand.hbm [shape: f32[8,128], index: 7, kind: output, shape index: {}]  }
   0x1   :  { %13 = vsyncpa [#allocation6], 0 }
   0x2   :  { %14 = vsyncpa [#allocation9], 0 }
   0x3   :  { %15 = vsyncpa [#allocation4], 0  ;;  %s2274_s24 = smov [#allocation5]   ;;  %s2275_s26 = smov [#allocation2]  }
   0x4   :  { %s32_s25 = sshll.u32 %s2274_s24, 4  ;;  %s22_s27 = sshll.u32 %s2275_s26, 4  ;;  %s33_s25 = int_to_ptr.vmem [resolvable:$true] %s32_s25  ;;  %s23_s27 = int_to_ptr.vmem [resolvable:$true] %s22_s27 }
   0x5   :  { %s2156_s30 = scalar_lea.hbm %s2466_s1, 320 }
   0x6   :  { %p2157_p0 = scmp.ne.s32.totalorder %s2466_s1, %s2156_s30  ;;  %p2160_p1 = scmp.lt.u32.totalorder %s2156_s30, %s2466_s1 }
   0x8   :  { %p2162_p2 = pnand %p2160_p1, %p2157_p0 }
   0xa   :  { %2165 = shalt.err (!%p2162_p2)
}
   0xb   :  { %s2166_s12 = scalar_lea.vmem %s33_s25, 320  ;;  %p2171_p4 = scmp.lt.s32.totalorder %s33_s25, %s33_s25 }
   0xc   :  { %p2167_p3 = scmp.ne.s32.totalorder %s33_s25, %s2166_s12  ;;  %p2172_p5 = scmp.lt.s32.totalorder %s2166_s12, %s2166_s12 }
   0xe   :  { %p2173_p6 = por %p2172_p5, %p2171_p4 }
  0x10   :  { %p2174_p7 = pnand %p2173_p6, %p2167_p3 }
  0x12   :  { %2177 = shalt.err (!%p2174_p7)
}
  0x13   :  { %35 = dma.hbm_to_vmem [thread:$0]  %s2466_s1, 320, %s33_s25, [#allocation6]  }
  0x14   :  { %s2178_s17 = scalar_lea.hbm %s2465_s0, 128 }
  0x15   :  { %p2179_p8 = scmp.ne.s32.totalorder %s2465_s0, %s2178_s17  ;;  %p2182_p9 = scmp.lt.u32.totalorder %s2178_s17, %s2465_s0 }
  0x17   :  { %p2184_p10 = pnand %p2182_p9, %p2179_p8 }
  0x19   :  { %2187 = shalt.err (!%p2184_p10)
}
  0x1a   :  { %s2188_s22 = scalar_lea.vmem %s23_s27, 128  ;;  %p2193_p12 = scmp.lt.s32.totalorder %s23_s27, %s23_s27 }
  0x1b   :  { %p2189_p11 = scmp.ne.s32.totalorder %s23_s27, %s2188_s22  ;;  %p2194_p13 = scmp.lt.s32.totalorder %s2188_s22, %s2188_s22 }
  0x1d   :  { %p2195_p0 = por %p2194_p13, %p2193_p12 }
  0x1f   :  { %p2196_p1 = pnand %p2195_p0, %p2189_p11 }
  0x21   :  { %2199 = shalt.err (!%p2196_p1)
}
  0x22   :  { %25 = dma.hbm_to_vmem [thread:$0]  %s2465_s0, 128, %s23_s27, [#allocation3]  }
  0x23   :  { %s2276_s24 = smov [#allocation7]   ;;  %s2200_s29 = scalar_lea.hbm %s2468_s3, 15360 }
  0x24   :  { %s43_s25 = sshll.u32 %s2276_s24, 4  ;;  %p2201_p2 = scmp.ne.s32.totalorder %s2468_s3, %s2200_s29  ;;  %s44_s25 = int_to_ptr.vmem [resolvable:$true] %s43_s25 }
  0x25   :  { %p2204_p3 = scmp.lt.u32.totalorder %s2200_s29, %s2468_s3 }
  0x27   :  { %p2206_p4 = pnand %p2204_p3, %p2201_p2 }
  0x29   :  { %2209 = shalt.err (!%p2206_p4)
}
  0x2a   :  { %s2210_s11 = scalar_lea.vmem %s44_s25, 15360  ;;  %p2215_p6 = scmp.lt.s32.totalorder %s44_s25, %s44_s25 }
  0x2b   :  { %p2211_p5 = scmp.ne.s32.totalorder %s44_s25, %s2210_s11  ;;  %p2216_p7 = scmp.lt.s32.totalorder %s2210_s11, %s2210_s11 }
  0x2d   :  { %p2217_p8 = por %p2216_p7, %p2215_p6 }
  0x2f   :  { %p2218_p9 = pnand %p2217_p8, %p2211_p5 }
  0x31   :  { %2221 = shalt.err (!%p2218_p9)
}
  0x32   :  { %s2277_s0 = smov 192   ;;  %s2278_s27 = smov 12  }
  0x33   :  { %49 = dma.hbm_to_vmem [thread:$0]  %s2468_s3, 15360, %s44_s25, [#allocation6], %s2277_s0, %s2277_s0, %s2278_s27  }
  0x34   :  { %s2279_s14 = smov [#allocation8]   ;;  %s2222_s18 = scalar_lea.hbm %s2470_s5, 3072 }
  0x35   :  { %s57_s15 = sshll.u32 %s2279_s14, 4  ;;  %p2223_p10 = scmp.ne.s32.totalorder %s2470_s5, %s2222_s18  ;;  %s58_s15 = int_to_ptr.vmem [resolvable:$true] %s57_s15 }
  0x36   :  { %p2226_p11 = scmp.lt.u32.totalorder %s2222_s18, %s2470_s5 }
  0x38   :  { %p2228_p12 = pnand %p2226_p11, %p2223_p10 }
  0x3a   :  { %2231 = shalt.err (!%p2228_p12)
}
  0x3b   :  { %s2232_s1 = scalar_lea.vmem %s58_s15, 3072  ;;  %p2237_p0 = scmp.lt.s32.totalorder %s58_s15, %s58_s15 }
  0x3c   :  { %p2233_p13 = scmp.ne.s32.totalorder %s58_s15, %s2232_s1  ;;  %p2238_p1 = scmp.lt.s32.totalorder %s2232_s1, %s2232_s1 }
  0x3e   :  { %p2239_p2 = por %p2238_p1, %p2237_p0 }
  0x40   :  { %p2240_p3 = pnand %p2239_p2, %p2233_p13 }
  0x42   :  { %2243 = shalt.err (!%p2240_p3)
}
  0x43   :  { %s2280_s3 = smov 64   ;;  %s2281_s23 = smov 4  }
  0x44   :  { %63 = dma.hbm_to_vmem [thread:$0]  %s2470_s5, 3072, %s58_s15, [#allocation9], %s2280_s3, %s2280_s3, %s2281_s23  }
  0x45   :  { %2266 = dma.done.wait [#allocation3], 128  }
  0x46   :  { %2267 = vsyncadd [#allocation3], 4294967168 }
  0x47   :  { %2268 = dma.done.wait [#allocation6], 15680  }
  0x48   :  { %2269 = vsyncadd [#allocation6], 4294951616 }
  0x49   :  { %2270 = dma.done.wait [#allocation9], 3072  }
  0x4a   :  { %2271 = vsyncadd [#allocation9], 4294964224  ;;  %v2282_v0 = vmov 0   ;;  %v81_v1 = vld [vmem:[#allocation5] sm:$0xff]  ;;  %vm128_vm0 = vcmask 1043456   ;;  %v79_v2 = vld [vmem:[#allocation2] sm:$0xff] }
  0x4b   :  { %176 = vmatprep.mubr.bf16.mxu0 %v2282_v0  ;;  %217 = vmatprep.mubr.bf16.mxu1 %v2282_v0  ;;  %v82_v3 = vld [vmem:[#allocation5 + $0x8] sm:$0xff]  ;;  %v1657_v4 = vcombine.high %v81_v1, %v81_v1  ;;  %v1656_v5 = vcombine.low %v81_v1, %v81_v1  ;;  %v1969_v7 = vld [vmem:[#allocation5 + $0x10] ss:$0 sps:$4 sm:$0xff]   ;;  %v1972_v9 = vld [vmem:[#allocation7 + $0x4] ss:$12 sps:$4 sm:$0xff]   ;;  %v80_v11 = vpack.c.bf16 %v79_v2, %v79_v2  ;;  %vm124_vm1 = vcmask 64512  }
  0x4c   :  { %v1659_v6 = vcombine.high %v82_v3, %v82_v3  ;;  %v1658_v8 = vcombine.low %v82_v3, %v82_v3  ;;  %v2283_v13 = vmov 0.0   ;;  %v142_v14 = vsel %vm128_vm0, %v1969_v7, 0  ;;  %v1970_v15 = vld [vmem:[#allocation7] ss:$12 sps:$4 sm:$0xff]   ;;  %v1975_v16 = vld [vmem:[#allocation7 + $0x1c] ss:$12 sps:$4 sm:$0xff]  }
  0x4d   :  { %1661 = vmatprep.subr.msk.bf16.mxu0 %vm128_vm0, %v1657_v4  ;;  %v130_v10 = vsel %vm128_vm0, %v1656_v5, 0  ;;  %vm2284_vm2 = vmmov 0   ;;  %v1973_v17 = vld [vmem:[#allocation7 + $0x18] ss:$12 sps:$4 sm:$0xff]   ;;  %v1978_v18 = vld [vmem:[#allocation7 + $0x34] ss:$12 sps:$4 sm:$0xff]   ;;  %v86_v1 = vlaneseq }
  0x4e   :  { %1663 = vmatprep.subr.msk.bf16.mxu1 %vm128_vm0, %v1659_v6  ;;  %145 = vmatpush1.bf16.msra.mxu0 %v130_v10  ;;  %v136_v12 = vsel %vm128_vm0, %v1658_v8, 0  ;;  %v1976_v19 = vld [vmem:[#allocation7 + $0x30] ss:$12 sps:$4 sm:$0xff]   ;;  %v1981_v20 = vld [vmem:[#allocation7 + $0x4c] ss:$12 sps:$4 sm:$0xff]   ;;  %s2285_s30 = smov [#allocation10]  }
  0x4f   :  { %186 = vmatpush1.bf16.msra.mxu1 %v136_v12  ;;  %1897 = vmatprep.subr.bf16.mxu0 %v2283_v13  ;;  %v1997_v21 = vld [vmem:[#allocation7 + $0xc8] ss:$12 sps:$4 sm:$0xff]   ;;  %v1984_v24 = vld [vmem:[#allocation7 + $0x64] ss:$12 sps:$4 sm:$0xff]   ;;  %v2002_v25 = vld [vmem:[#allocation7 + $0xe0] ss:$12 sps:$4 sm:$0xff]  }
  0x50   :  { %1103 = vmatprep.subr.bf16.mxu1 %v1972_v9  ;;  %v1998_v22 = vld [vmem:[#allocation7 + $0x8] ss:$12 sps:$4 sm:$0xff]   ;;  %v2003_v26 = vld [vmem:[#allocation7 + $0x20] ss:$12 sps:$4 sm:$0xff]   ;;  %v2007_v29 = vld [vmem:[#allocation7 + $0xf8] ss:$12 sps:$4 sm:$0xff]  }
  0x51   :  { %1662 = vmatmul.mubr.msk.bf16.vlgmr.msra.gmra.mrb[0].mxu0 %vm124_vm1, %v80_v11  ;;  %v1979_v23 = vld [vmem:[#allocation7 + $0x48] ss:$12 sps:$4 sm:$0xff]   ;;  %v1982_v27 = vld [vmem:[#allocation7 + $0x60] ss:$12 sps:$4 sm:$0xff]   ;;  %v2008_v30 = vld [vmem:[#allocation7 + $0x38] ss:$12 sps:$4 sm:$0xff]  }
  0x52   :  { %1664 = vmatmul.mubr.msk.bf16.vlgmr.msra.gmra.mrb[0].mxu1 %vm124_vm1, %v80_v11  ;;  %1898 = vmatpush3.bf16.msra.mxu0 %v142_v14  ;;  %v1987_v28 = vld [vmem:[#allocation7 + $0x7c] ss:$12 sps:$4 sm:$0xff]   ;;  %v1985_v31 = vld [vmem:[#allocation7 + $0x78] ss:$12 sps:$4 sm:$0xff]   ;;  %v1990_v34 = vld [vmem:[#allocation7 + $0x94] ss:$12 sps:$4 sm:$0xff]  }
  0x53   :  { %1899 = vmatprep.mubr.msk.bf16.mxu0 %vm2284_vm2, %v2283_v13  ;;  %1104 = vmatpush1.bf16.msra.mxu1 %v1970_v15  ;;  %v2012_v32 = vld [vmem:[#allocation7 + $0x110] ss:$12 sps:$4 sm:$0xff]   ;;  %v2017_v35 = vld [vmem:[#allocation7 + $0x128] ss:$12 sps:$4 sm:$0xff]   ;;  %v1993_v38 = vld [vmem:[#allocation7 + $0xac] ss:$12 sps:$4 sm:$0xff]  }
  0x54   :  { %1105 = vmatprep.subr.bf16.mxu1 %v1975_v16  ;;  %1813 = vmatprep.subr.bf16.mxu0 %v1997_v21  ;;  %v2013_v33 = vld [vmem:[#allocation7 + $0x50] ss:$12 sps:$4 sm:$0xff]   ;;  %v2018_v37 = vld [vmem:[#allocation7 + $0x68] ss:$12 sps:$4 sm:$0xff]   ;;  %v2022_v40 = vld [vmem:[#allocation7 + $0x140] ss:$12 sps:$4 sm:$0xff]  }
  0x55   :  { %v1988_v36 = vld [vmem:[#allocation7 + $0x90] ss:$12 sps:$4 sm:$0xff]   ;;  %v1991_v39 = vld [vmem:[#allocation7 + $0xa8] ss:$12 sps:$4 sm:$0xff]   ;;  %v2023_v42 = vld [vmem:[#allocation7 + $0x80] ss:$12 sps:$4 sm:$0xff]  }
  0x56   :  { %v1996_v41 = vld [vmem:[#allocation7 + $0xc4] ss:$12 sps:$4 sm:$0xff]   ;;  %v1994_v43 = vld [vmem:[#allocation7 + $0xc0] ss:$12 sps:$4 sm:$0xff]   ;;  %v2001_v44 = vld [vmem:[#allocation7 + $0xdc] ss:$12 sps:$4 sm:$0xff]  }
  0x57   :  { %1106 = vmatpush1.bf16.msra.mxu1 %v1973_v17  ;;  %v1999_v45 = vld [vmem:[#allocation7 + $0xd8] ss:$12 sps:$4 sm:$0xff]   ;;  %v2006_v46 = vld [vmem:[#allocation7 + $0xf4] ss:$12 sps:$4 sm:$0xff]   ;;  %v2004_v47 = vld [vmem:[#allocation7 + $0xf0] ss:$12 sps:$4 sm:$0xff]  }
  0x58   :  { %1107 = vmatprep.subr.bf16.mxu1 %v1978_v18  ;;  %v2011_v48 = vld [vmem:[#allocation7 + $0x10c] ss:$12 sps:$4 sm:$0xff]   ;;  %v2009_v49 = vld [vmem:[#allocation7 + $0x108] ss:$12 sps:$4 sm:$0xff]   ;;  %v2016_v50 = vld [vmem:[#allocation7 + $0x124] ss:$12 sps:$4 sm:$0xff]  }
  0x59   :  { %1900 = vmatmul.mubr.msk.bf16.vlgmr.msra.gmra.mrb[4].mxu0 %vm124_vm1, %v80_v11  ;;  %v2014_v51 = vld [vmem:[#allocation7 + $0x120] ss:$12 sps:$4 sm:$0xff]   ;;  %v2021_v52 = vld [vmem:[#allocation7 + $0x13c] ss:$12 sps:$4 sm:$0xff]   ;;  %v2019_v53 = vld [vmem:[#allocation7 + $0x138] ss:$12 sps:$4 sm:$0xff]  }
  0x5a   :  { %1814 = vmatpush3.bf16.msra.mxu0 %v1998_v22  ;;  %v2026_v54 = vld [vmem:[#allocation7 + $0x154] ss:$12 sps:$4 sm:$0xff]   ;;  %v2027_v55 = vld [vmem:[#allocation7 + $0x158] ss:$12 sps:$4 sm:$0xff]   ;;  %v2024_v56 = vld [vmem:[#allocation7 + $0x150] ss:$12 sps:$4 sm:$0xff]  }
  0x5b   :  { %1108 = vmatpush1.bf16.msra.mxu1 %v1976_v19  ;;  %1815 = vmatprep.subr.bf16.mxu0 %v2002_v25  ;;  %v2028_v57 = vld [vmem:[#allocation7 + $0x98] ss:$12 sps:$4 sm:$0xff]   ;;  %v2032_v59 = vld [vmem:[#allocation7 + $0x170] ss:$12 sps:$4 sm:$0xff]   ;;  %v2029_v60 = vld [vmem:[#allocation7 + $0x168] ss:$12 sps:$4 sm:$0xff]  }
  0x5c   :  { %1109 = vmatprep.subr.bf16.mxu1 %v1981_v20  ;;  %v2031_v58 = vld [vmem:[#allocation7 + $0x16c] ss:$12 sps:$4 sm:$0xff]   ;;  %v2033_v61 = vld [vmem:[#allocation7 + $0xb0] ss:$12 sps:$4 sm:$0xff]   ;;  %v2037_v63 = vld [vmem:[#allocation7 + $0x248] ss:$12 sps:$4 sm:$0xff]  }
  0x5d   :  { %v2036_v62 = vld [vmem:[#allocation7 + $0x184] ss:$12 sps:$4 sm:$0xff]   ;;  %v2387_v2 = vshrl.u32 %v86_v1, 7  ;;  %s1645_s8 = sshll.u32 %s2285_s30, 4  ;;  %s1646_s8 = int_to_ptr.vmem [resolvable:$true] %s1645_s8 }
  0x5e   :  { %1816 = vmatpush3.bf16.msra.mxu0 %v2003_v26  ;;  %v2393_v4 = vld [vmem:[%s2467_s2] sm:$0x1f]  ;;  %s2244_s9 = scalar_lea.vmem %s1646_s8, 128  ;;  %p2249_p5 = scmp.lt.s32.totalorder %s1646_s8, %s1646_s8 }
  0x5f   :  { %1110 = vmatpush1.bf16.msra.mxu1 %v1979_v23  ;;  %1817 = vmatprep.subr.bf16.mxu0 %v2007_v29  ;;  %v88_v3 = vsub.s32 0, %v2387_v2  ;;  %v92_v5 = vsub.s32 1, %v2387_v2  ;;  %v100_v6 = vsub.s32 3, %v2387_v2  ;;  %v2038_v29 = vld [vmem:[#allocation7 + $0x188] ss:$12 sps:$4 sm:$0xff]   ;;  %p2245_p4 = scmp.ne.s32.totalorder %s1646_s8, %s2244_s9  ;;  %p2250_p6 = scmp.lt.s32.totalorder %s2244_s9, %s2244_s9 }
  0x60   :  { %1111 = vmatprep.subr.bf16.mxu1 %v1984_v24  ;;  %v2068_v1 = vld [vmem:[#allocation7 + $0x218] ss:$12 sps:$4 sm:$0xff]  }
  0x61   :  { %v89_v7 = vrot.slane %v2393_v4, %v88_v3  ;;  %v93_v8 = vrot.slane %v2393_v4, %v92_v5  ;;  %v101_v9 = vrot.slane %v2393_v4, %v100_v6  ;;  %v2071_v6 = vld [vmem:[#allocation7 + $0x22c] ss:$12 sps:$4 sm:$0xff]   ;;  %p2251_p7 = por %p2250_p6, %p2249_p5 }
  0x62   :  { %1818 = vmatpush3.bf16.msra.mxu0 %v2008_v30 }
  0x63   :  { %1112 = vmatpush1.bf16.msra.mxu1 %v1982_v27  ;;  %1819 = vmatprep.subr.bf16.mxu0 %v2012_v32  ;;  %v2041_v32 = vld [vmem:[#allocation7 + $0x19c] ss:$12 sps:$4 sm:$0xff]   ;;  %p2252_p8 = pnand %p2251_p7, %p2245_p4 }
  0x64   :  { %1113 = vmatprep.subr.bf16.mxu1 %v1987_v28  ;;  %v2034_v28 = vld [vmem:[#allocation7 + $0x180] ss:$12 sps:$4 sm:$0xff]  }
  0x66   :  { %1820 = vmatpush3.bf16.msra.mxu0 %v2013_v33  ;;  %v2042_v33 = vld [vmem:[#allocation7 + $0x260] ss:$12 sps:$4 sm:$0xff]  }
  0x67   :  { %1114 = vmatpush1.bf16.msra.mxu1 %v1985_v31  ;;  %1821 = vmatprep.subr.bf16.mxu0 %v2017_v35 }
  0x68   :  { %1115 = vmatprep.subr.bf16.mxu1 %v1990_v34 }
  0x6a   :  { %1822 = vmatpush3.bf16.msra.mxu0 %v2018_v37 }
  0x6b   :  { %1116 = vmatpush1.bf16.msra.mxu1 %v1988_v36  ;;  %1823 = vmatprep.subr.bf16.mxu0 %v2022_v40 }
  0x6c   :  { %1117 = vmatprep.subr.bf16.mxu1 %v1993_v38  ;;  %v2039_v38 = vld [vmem:[#allocation7 + $0x198] ss:$12 sps:$4 sm:$0xff]  }
  0x6e   :  { %1824 = vmatpush3.bf16.msra.mxu0 %v2023_v42  ;;  %v2047_v42 = vld [vmem:[#allocation7 + $0x278] ss:$12 sps:$4 sm:$0xff]  }
  0x6f   :  { %1118 = vmatpush1.bf16.msra.mxu1 %v1991_v39  ;;  %1825 = vmatprep.subr.bf16.mxu0 %v2027_v55  ;;  %v2043_v39 = vld [vmem:[#allocation7 + $0x1a0] ss:$12 sps:$4 sm:$0xff]   ;;  %v2061_v55 = vld [vmem:[#allocation7 + $0x1fc] ss:$12 sps:$4 sm:$0xff]  }
  0x70   :  { %1119 = vmatprep.subr.bf16.mxu1 %v1996_v41  ;;  %v2046_v41 = vld [vmem:[#allocation7 + $0x1b4] ss:$12 sps:$4 sm:$0xff]  }
  0x72   :  { %1826 = vmatpush3.bf16.msra.mxu0 %v2028_v57  ;;  %v2059_v57 = vld [vmem:[#allocation7 + $0x1f8] ss:$12 sps:$4 sm:$0xff]  }
  0x73   :  { %1120 = vmatpush1.bf16.msra.mxu1 %v1994_v43  ;;  %1827 = vmatprep.subr.bf16.mxu0 %v2032_v59  ;;  %v2044_v43 = vld [vmem:[#allocation7 + $0x1b0] ss:$12 sps:$4 sm:$0xff]  }
  0x74   :  { %1121 = vmatprep.subr.bf16.mxu1 %v2001_v44  ;;  %v2048_v44 = vld [vmem:[#allocation7 + $0x1b8] ss:$12 sps:$4 sm:$0xff]  }
  0x76   :  { %1828 = vmatpush3.bf16.msra.mxu0 %v2033_v61  ;;  %v2067_v61 = vld [vmem:[#allocation7 + $0x2d8] ss:$12 sps:$4 sm:$0xff]  }
  0x77   :  { %1122 = vmatpush1.bf16.msra.mxu1 %v1999_v45  ;;  %1835 = vmatprep.subr.bf16.mxu0 %v2037_v63  ;;  %v2051_v45 = vld [vmem:[#allocation7 + $0x1cc] ss:$12 sps:$4 sm:$0xff]   ;;  %v2064_v63 = vld [vmem:[#allocation7 + $0x210] ss:$12 sps:$4 sm:$0xff]  }
  0x78   :  { %1123 = vmatprep.subr.bf16.mxu1 %v2006_v46  ;;  %v2052_v46 = vld [vmem:[#allocation7 + $0x290] ss:$12 sps:$4 sm:$0xff]  }
  0x7b   :  { %1124 = vmatpush1.bf16.msra.mxu1 %v2004_v47  ;;  %v2049_v47 = vld [vmem:[#allocation7 + $0x1c8] ss:$12 sps:$4 sm:$0xff]  }
  0x7c   :  { %1125 = vmatprep.subr.bf16.mxu1 %v2011_v48  ;;  %v2053_v48 = vld [vmem:[#allocation7 + $0x1d0] ss:$12 sps:$4 sm:$0xff]  }
  0x7f   :  { %1126 = vmatpush1.bf16.msra.mxu1 %v2009_v49  ;;  %v96_v49 = vsub.s32 2, %v2387_v2 }
  0x80   :  { %1127 = vmatprep.subr.bf16.mxu1 %v2016_v50  ;;  %v2056_v50 = vld [vmem:[#allocation7 + $0x1e4] ss:$12 sps:$4 sm:$0xff]  }
  0x83   :  { %1128 = vmatpush1.bf16.msra.mxu1 %v2014_v51  ;;  %v2057_v51 = vld [vmem:[#allocation7 + $0x2a8] ss:$12 sps:$4 sm:$0xff]  }
  0x84   :  { %1129 = vmatprep.subr.bf16.mxu1 %v2021_v52  ;;  %v2054_v52 = vld [vmem:[#allocation7 + $0x1e0] ss:$12 sps:$4 sm:$0xff]  }
  0x87   :  { %1130 = vmatpush1.bf16.msra.mxu1 %v2019_v53  ;;  %v2058_v53 = vld [vmem:[#allocation7 + $0x1e8] ss:$12 sps:$4 sm:$0xff]  }
  0x88   :  { %1131 = vmatprep.subr.bf16.mxu1 %v2026_v54  ;;  %v97_v54 = vrot.slane %v2393_v4, %v96_v49 }
  0x8b   :  { %1132 = vmatpush1.bf16.msra.mxu1 %v2024_v56  ;;  %v2062_v56 = vld [vmem:[#allocation7 + $0x2c0] ss:$12 sps:$4 sm:$0xff]  }
  0x8c   :  { %1133 = vmatprep.subr.bf16.mxu1 %v2031_v58  ;;  %v2063_v58 = vld [vmem:[#allocation7 + $0x200] ss:$12 sps:$4 sm:$0xff]  }
  0x8f   :  { %1134 = vmatpush1.bf16.msra.mxu1 %v2029_v60  ;;  %v2066_v60 = vld [vmem:[#allocation7 + $0x214] ss:$12 sps:$4 sm:$0xff]  }
  0x90   :  { %1144 = vmatprep.subr.bf16.mxu1 %v2036_v62 }
 0x124   :  { %v178_v10 = vpop.f32.mrb[0].mxu0 }
 0x125   :  { %v179_v11 = vadd.f32 %v178_v10, %v89_v7  ;;  %v180_v12 = vpop.f32.mrb[1].mxu0  ;;  %v2404_v14 = vpop.f32.mrb[0].mxu1  ;;  %v2072_v7 = vld [vmem:[#allocation7 + $0x2f0] ss:$12 sps:$4 sm:$0xff]  }
 0x126   :  { %v181_v15 = vadd.f32 %v180_v12, %v93_v8  ;;  %v182_v16 = vpop.f32.mrb[2].mxu0  ;;  %v221_v17 = vpop.f32.mrb[1].mxu1  ;;  %v220_v59 = vadd.f32 %v2404_v14, %v97_v54  ;;  %v2073_v10 = vld [vmem:[#allocation7 + $0x230] ss:$12 sps:$4 sm:$0xff]   ;;  %v2074_v14 = vld [vmem:[#allocation7 + $0x240] ss:$12 sps:$4 sm:$0xff]  }
 0x127   :  { %vm266_vm3 = vcmp.gt.f32.partialorder %v179_v11, 0.0  ;;  %v271_v18 = vmul.f32 0.01, %v179_v11  ;;  %v183_v19 = vpop.f32.mrb[3].mxu0  ;;  %v222_v20 = vadd.f32 %v221_v17, %v101_v9  ;;  %v223_v21 = vpop.f32.mrb[2].mxu1 }
 0x128   :  { %vm267_vm4 = vcmp.gt.f32.partialorder %v181_v15, 0.0  ;;  %v272_v22 = vmul.f32 0.01, %v181_v15  ;;  %v224_v25 = vpop.f32.mrb[3].mxu1  ;;  %v273_v62 = vmul.f32 0.01, %v220_v59 }
 0x129   :  { %v276_v23 = vsel %vm266_vm3, %v179_v11, %v271_v18  ;;  %vm269_vm5 = vcmp.gt.f32.partialorder %v222_v20, 0.0  ;;  %v274_v24 = vmul.f32 0.01, %v222_v20  ;;  %vm268_vm6 = vcmp.gt.f32.partialorder %v220_v59, 0.0  ;;  %v2069_v9 = vld [vmem:[#allocation7 + $0x228] ss:$12 sps:$4 sm:$0xff]  }
 0x12a   :  { %v277_v26 = vsel %vm267_vm4, %v181_v15, %v272_v22  ;;  %v281_v31 = vpack.c.bf16 %v276_v23, %v276_v23  ;;  %v278_v8 = vsel %vm268_vm6, %v220_v59, %v273_v62  ;;  %v2076_v11 = vld [vmem:[#allocation7 + $0x244] ss:$12 sps:$4 sm:$0xff]   ;;  %v2077_v15 = vld [vmem:[#allocation7 + $0x308] ss:$12 sps:$4 sm:$0xff]   ;;  %v2081_v18 = vld [vmem:[#allocation7 + $0x320] ss:$12 sps:$4 sm:$0xff]  }
 0x12b   :  { %v282_v27 = vpack.c.bf16 %v277_v26, %v277_v26  ;;  %v279_v30 = vsel %vm269_vm5, %v222_v20, %v274_v24  ;;  %v2413_v12 = vpack.c.bf16 %v278_v8, %v278_v8  ;;  %v2080_v16 = vld [vmem:[#allocation7 + $0x25c] ss:$12 sps:$4 sm:$0xff]   ;;  %v2078_v17 = vld [vmem:[#allocation7 + $0x258] ss:$12 sps:$4 sm:$0xff]   ;;  %v2084_v19 = vld [vmem:[#allocation7 + $0x274] ss:$12 sps:$4 sm:$0xff]  }
 0x12c   :  { %v2406_v34 = vpop.f32.mrb[4].mxu0  ;;  %v284_v35 = vpack.c.bf16 %v279_v30, %v279_v30  ;;  %v2082_v20 = vld [vmem:[#allocation7 + $0x270] ss:$12 sps:$4 sm:$0xff]   ;;  %v2085_v21 = vld [vmem:[#allocation7 + $0x338] ss:$12 sps:$4 sm:$0xff]   ;;  %v104_v25 = vsub.s32 4, %v2387_v2 }
 0x12d   :  { %1135 = vmatprep.mubr.bf16.mxu1 %v282_v27  ;;  %1258 = vmatprep.mubr.bf16.mxu0 %v282_v27  ;;  %v1901_v36 = vpop.f32.mrb[5].mxu0  ;;  %v2088_v22 = vld [vmem:[#allocation7 + $0x28c] ss:$12 sps:$4 sm:$0xff]   ;;  %v2086_v23 = vld [vmem:[#allocation7 + $0x288] ss:$12 sps:$4 sm:$0xff]   ;;  %v2131_v59 = vld [vmem:[#allocation8] sm:$0xff]  }
 0x12e   :  { %1136 = vmatmul.mubr.bf16.vlgmr.msra.gmra.mrb[4].mxu1 %v281_v31  ;;  %1259 = vmatmul.mubr.bf16.vlgmr.msra.gmra.mrb[8].mxu0 %v281_v31  ;;  %v263_v37 = vpop.f32.mrb[6].mxu0  ;;  %v2089_v24 = vld [vmem:[#allocation7 + $0x350] ss:$12 sps:$4 sm:$0xff]   ;;  %v2090_v27 = vld [vmem:[#allocation7 + $0x2a0] ss:$12 sps:$4 sm:$0xff]  }
 0x12f   :  { %1145 = vmatpush1.bf16.msra.mxu1 %v2034_v28  ;;  %1836 = vmatpush3.bf16.msra.mxu0 %v2038_v29  ;;  %v1902_v40 = vpop.f32.mrb[7].mxu0  ;;  %v2092_v26 = vld [vmem:[#allocation7 + $0x2a4] ss:$12 sps:$4 sm:$0xff]   ;;  %v2093_v28 = vld [vmem:[#allocation7 + $0x368] ss:$12 sps:$4 sm:$0xff]   ;;  %v105_v29 = vrot.slane %v2393_v4, %v104_v25 }
 0x130   :  { %1146 = vmatprep.subr.bf16.mxu1 %v2041_v32  ;;  %1837 = vmatprep.subr.bf16.mxu0 %v2042_v33  ;;  %v2096_v30 = vld [vmem:[#allocation7 + $0x2bc] ss:$12 sps:$4 sm:$0xff]   ;;  %v2094_v31 = vld [vmem:[#allocation7 + $0x2b8] ss:$12 sps:$4 sm:$0xff]   ;;  %v2097_v32 = vld [vmem:[#allocation7 + $0x380] ss:$12 sps:$4 sm:$0xff]  }
 0x131   :  { %1298 = vmatprep.mubr.bf16.mxu0 %v284_v35  ;;  %1176 = vmatprep.mubr.bf16.mxu1 %v284_v35  ;;  %v261_v33 = vadd.f32 %v2406_v34, %v105_v29  ;;  %v2100_v35 = vld [vmem:[#allocation7 + $0x2d4] ss:$12 sps:$4 sm:$0xff]   ;;  %v2098_v37 = vld [vmem:[#allocation7 + $0x2d0] ss:$12 sps:$4 sm:$0xff]   ;;  %v2104_v4 = vld [vmem:[#allocation7 + $0x2ec] ss:$12 sps:$4 sm:$0xff]  }
 0x132   :  { %v2102_v40 = vld [vmem:[#allocation7 + $0x2e8] ss:$12 sps:$4 sm:$0xff]   ;;  %v2108_v34 = vld [vmem:[#allocation7 + $0x304] ss:$12 sps:$4 sm:$0xff]  }
 0x133   :  { %1147 = vmatpush1.bf16.msra.mxu1 %v2039_v38  ;;  %1838 = vmatpush3.bf16.msra.mxu0 %v2043_v39  ;;  %v275_v36 = vmul.f32 0.01, %v261_v33  ;;  %v2101_v38 = vld [vmem:[#allocation7 + $0x398] ss:$12 sps:$4 sm:$0xff]   ;;  %vm270_vm7 = vcmp.gt.f32.partialorder %v261_v33, 0.0  ;;  %v2134_v62 = vld [vmem:[#allocation8 + $0x50] sm:$0xff]  }
 0x134   :  { %1148 = vmatprep.subr.bf16.mxu1 %v2046_v41  ;;  %1839 = vmatprep.subr.bf16.mxu0 %v2047_v42  ;;  %v2105_v41 = vld [vmem:[#allocation7 + $0x3b0] ss:$12 sps:$4 sm:$0xff]   ;;  %v2121_v54 = vld [vmem:[#allocation7 + $0x378] ss:$12 sps:$4 sm:$0xff]   ;;  %v2147_v2 = vld [vmem:[#allocation8 + $0x88] sm:$0xff]  }
 0x135   :  { %v280_v39 = vsel %vm270_vm7, %v261_v33, %v275_v36  ;;  %v2139_v8 = vld [vmem:[#allocation8 + $0x20] sm:$0xff]  }
 0x136   :  { %v285_v42 = vpack.c.bf16 %v280_v39, %v280_v39 }
 0x137   :  { %1149 = vmatpush1.bf16.msra.mxu1 %v2044_v43  ;;  %1840 = vmatpush3.bf16.msra.mxu0 %v2048_v44  ;;  %v2106_v43 = vld [vmem:[#allocation7 + $0x300] ss:$12 sps:$4 sm:$0xff]   ;;  %v2111_v44 = vld [vmem:[#allocation7 + $0x31c] ss:$12 sps:$4 sm:$0xff]  }
 0x138   :  { %1150 = vmatprep.subr.bf16.mxu1 %v2051_v45  ;;  %1841 = vmatprep.subr.bf16.mxu0 %v2052_v46  ;;  %v2109_v45 = vld [vmem:[#allocation7 + $0x318] ss:$12 sps:$4 sm:$0xff]   ;;  %v2114_v46 = vld [vmem:[#allocation7 + $0x334] ss:$12 sps:$4 sm:$0xff]  }
 0x13b   :  { %1151 = vmatpush1.bf16.msra.mxu1 %v2049_v47  ;;  %1842 = vmatpush3.bf16.msra.mxu0 %v2053_v48  ;;  %v2112_v47 = vld [vmem:[#allocation7 + $0x330] ss:$12 sps:$4 sm:$0xff]   ;;  %v2117_v48 = vld [vmem:[#allocation7 + $0x34c] ss:$12 sps:$4 sm:$0xff]  }
 0x13c   :  { %1152 = vmatprep.subr.bf16.mxu1 %v2056_v50  ;;  %1843 = vmatprep.subr.bf16.mxu0 %v2057_v51  ;;  %v2115_v50 = vld [vmem:[#allocation7 + $0x348] ss:$12 sps:$4 sm:$0xff]   ;;  %v2120_v51 = vld [vmem:[#allocation7 + $0x364] ss:$12 sps:$4 sm:$0xff]  }
 0x13f   :  { %1153 = vmatpush1.bf16.msra.mxu1 %v2054_v52  ;;  %1844 = vmatpush3.bf16.msra.mxu0 %v2058_v53  ;;  %v2118_v52 = vld [vmem:[#allocation7 + $0x360] ss:$12 sps:$4 sm:$0xff]   ;;  %v2123_v53 = vld [vmem:[#allocation7 + $0x37c] ss:$12 sps:$4 sm:$0xff]  }
 0x140   :  { %1154 = vmatprep.subr.bf16.mxu1 %v2061_v55  ;;  %1845 = vmatprep.subr.bf16.mxu0 %v2062_v56  ;;  %v2126_v55 = vld [vmem:[#allocation7 + $0x394] ss:$12 sps:$4 sm:$0xff]   ;;  %v2129_v56 = vld [vmem:[#allocation7 + $0x3ac] ss:$12 sps:$4 sm:$0xff]  }
 0x143   :  { %1155 = vmatpush1.bf16.msra.mxu1 %v2059_v57  ;;  %1846 = vmatpush3.bf16.msra.mxu0 %v2063_v58  ;;  %v2127_v57 = vld [vmem:[#allocation7 + $0x3a8] ss:$12 sps:$4 sm:$0xff]   ;;  %v2130_v58 = vld [vmem:[#allocation8 + $0x40] sm:$0xff]  }
 0x144   :  { %1156 = vmatprep.subr.bf16.mxu1 %v2066_v60  ;;  %1847 = vmatprep.subr.bf16.mxu0 %v2067_v61  ;;  %v2132_v60 = vld [vmem:[#allocation8 + $0x48] sm:$0xff]  }
 0x145   :  { %v2133_v61 = vld [vmem:[#allocation8 + $0x8] sm:$0xff]  }
 0x147   :  { %1157 = vmatpush1.bf16.msra.mxu1 %v2064_v63  ;;  %1848 = vmatpush3.bf16.msra.mxu0 %v2068_v1  ;;  %v2135_v63 = vld [vmem:[#allocation8 + $0x10] sm:$0xff]   ;;  %v2136_v1 = vld [vmem:[#allocation8 + $0x58] sm:$0xff]  }
 0x148   :  { %1158 = vmatprep.subr.bf16.mxu1 %v2071_v6  ;;  %1849 = vmatprep.subr.bf16.mxu0 %v2072_v7  ;;  %v2137_v6 = vld [vmem:[#allocation8 + $0x18] sm:$0xff]   ;;  %v2138_v7 = vld [vmem:[#allocation8 + $0x60] sm:$0xff]  }
 0x14b   :  { %1159 = vmatpush1.bf16.msra.mxu1 %v2069_v9  ;;  %1850 = vmatpush3.bf16.msra.mxu0 %v2073_v10  ;;  %v2140_v9 = vld [vmem:[#allocation8 + $0x68] sm:$0xff]  }
 0x14c   :  { %1160 = vmatprep.subr.bf16.mxu1 %v2076_v11  ;;  %1903 = vmatprep.subr.bf16.mxu0 %v2283_v13  ;;  %v2141_v10 = vld [vmem:[#allocation8 + $0x28] sm:$0xff]   ;;  %v2142_v11 = vld [vmem:[#allocation8 + $0x70] sm:$0xff]  }
 0x14e   :  { %1299 = vmatmul.mubr.bf16.vlgmr.msra.gmra.mrb[12].mxu0 %v2413_v12 }
 0x14f   :  { %1161 = vmatpush1.bf16.msra.mxu1 %v2074_v14  ;;  %1904 = vmatpush3.bf16.msra.mxu0 %v2077_v15  ;;  %v2144_v14 = vld [vmem:[#allocation8 + $0x78] sm:$0xff]  }
 0x150   :  { %1162 = vmatprep.subr.bf16.mxu1 %v2080_v16  ;;  %1905 = vmatprep.subr.bf16.mxu0 %v2283_v13  ;;  %v2145_v15 = vld [vmem:[#allocation8 + $0x38] sm:$0xff]  }
 0x151   :  { %1919 = vmatprep.mubr.msk.bf16.mxu0 %vm2284_vm2, %v2283_v13 }
 0x153   :  { %1163 = vmatpush1.bf16.msra.mxu1 %v2078_v17  ;;  %1906 = vmatpush3.bf16.msra.mxu0 %v2081_v18 }
 0x154   :  { %1164 = vmatprep.subr.bf16.mxu1 %v2084_v19  ;;  %1907 = vmatprep.subr.bf16.mxu0 %v2283_v13 }
 0x157   :  { %1165 = vmatpush1.bf16.msra.mxu1 %v2082_v20  ;;  %1908 = vmatpush3.bf16.msra.mxu0 %v2085_v21  ;;  %v446_v21 = vld [vmem:[%s2469_s4] sm:$0x7] }
 0x158   :  { %1166 = vmatprep.subr.bf16.mxu1 %v2088_v22  ;;  %1909 = vmatprep.subr.bf16.mxu0 %v2283_v13  ;;  %v459_v22 = vrot.slane %v446_v21, %v96_v49  ;;  %v451_v36 = vrot.slane %v446_v21, %v88_v3  ;;  %v2148_v3 = vld [vmem:[#allocation8 + $0x90] sm:$0xff]  }
 0x15b   :  { %1167 = vmatpush1.bf16.msra.mxu1 %v2086_v23  ;;  %1910 = vmatpush3.bf16.msra.mxu0 %v2089_v24 }
 0x15c   :  { %1168 = vmatprep.subr.bf16.mxu1 %v2092_v26  ;;  %1911 = vmatprep.subr.bf16.mxu0 %v2283_v13 }
 0x15f   :  { %1169 = vmatpush1.bf16.msra.mxu1 %v2090_v27  ;;  %1912 = vmatpush3.bf16.msra.mxu0 %v2093_v28 }
 0x160   :  { %1170 = vmatprep.subr.bf16.mxu1 %v2096_v30  ;;  %1913 = vmatprep.subr.bf16.mxu0 %v2283_v13 }
 0x163   :  { %1171 = vmatpush1.bf16.msra.mxu1 %v2094_v31  ;;  %1914 = vmatpush3.bf16.msra.mxu0 %v2097_v32 }
 0x164   :  { %1172 = vmatprep.subr.bf16.mxu1 %v2100_v35  ;;  %1915 = vmatprep.subr.bf16.mxu0 %v2283_v13 }
 0x167   :  { %1173 = vmatpush1.bf16.msra.mxu1 %v2098_v37  ;;  %1916 = vmatpush3.bf16.msra.mxu0 %v2101_v38  ;;  %v455_v37 = vrot.slane %v446_v21, %v92_v5  ;;  %v2149_v5 = vld [vmem:[#allocation8 + $0x98] sm:$0xff]  }
 0x168   :  { %1174 = vmatprep.subr.bf16.mxu1 %v2104_v4  ;;  %1917 = vmatprep.subr.bf16.mxu0 %v2283_v13 }
 0x16b   :  { %1175 = vmatpush1.bf16.msra.mxu1 %v2102_v40  ;;  %1918 = vmatpush3.bf16.msra.mxu0 %v2105_v41 }
 0x16c   :  { %1185 = vmatprep.subr.bf16.mxu1 %v2108_v34  ;;  %1866 = vmatprep.subr.bf16.mxu0 %v2130_v58 }
 0x16e   :  { %1177 = vmatmul.mubr.bf16.vlgmr.msra.gmra.mrb[4].mxu1 %v2413_v12  ;;  %1920 = vmatmul.mubr.bf16.vlgmr.msra.gmra.mrb[16].mxu0 %v285_v42  ;;  %v2143_v12 = vld [vmem:[#allocation8 + $0x30] sm:$0xff]  }
 0x16f   :  { %1186 = vmatpush1.bf16.msra.mxu1 %v2106_v43  ;;  %1217 = vmatprep.mubr.bf16.mxu1 %v2282_v0  ;;  %v2124_v0 = vld [vmem:[#allocation7 + $0x390] ss:$12 sps:$4 sm:$0xff]  }
 0x170   :  { %1187 = vmatprep.subr.bf16.mxu1 %v2111_v44  ;;  %1867 = vmatpush3.bf16.msra.mxu0 %v2131_v59 }
 0x171   :  { %1868 = vmatprep.subr.bf16.mxu0 %v2132_v60  ;;  %v1786_v60 = vld [vmem:[%s2471_s6] ss:$0 sm:$0xff] }
 0x173   :  { %1188 = vmatpush1.bf16.msra.mxu1 %v2109_v45 }
 0x174   :  { %1189 = vmatprep.subr.bf16.mxu1 %v2114_v46  ;;  %1869 = vmatpush3.bf16.msra.mxu0 %v2133_v61  ;;  %v2146_v46 = vld [vmem:[#allocation8 + $0x80] sm:$0xff]  }
 0x175   :  { %1870 = vmatprep.subr.bf16.mxu0 %v2134_v62 }
 0x177   :  { %1190 = vmatpush1.bf16.msra.mxu1 %v2112_v47 }
 0x178   :  { %1191 = vmatprep.subr.bf16.mxu1 %v2117_v48  ;;  %1871 = vmatpush3.bf16.msra.mxu0 %v2135_v63  ;;  %v2150_v48 = vld [vmem:[#allocation8 + $0xa0] sm:$0xff]  }
 0x179   :  { %1872 = vmatprep.subr.bf16.mxu0 %v2136_v1 }
 0x17b   :  { %1192 = vmatpush1.bf16.msra.mxu1 %v2115_v50  ;;  %v2151_v50 = vld [vmem:[#allocation8 + $0xa8] sm:$0xff]  }
 0x17c   :  { %1193 = vmatprep.subr.bf16.mxu1 %v2120_v51  ;;  %1873 = vmatpush3.bf16.msra.mxu0 %v2137_v6  ;;  %v2152_v51 = vld [vmem:[#allocation8 + $0xb0] sm:$0xff]  }
 0x17d   :  { %1874 = vmatprep.subr.bf16.mxu0 %v2138_v7 }
 0x17f   :  { %1194 = vmatpush1.bf16.msra.mxu1 %v2118_v52 }
 0x180   :  { %1195 = vmatprep.subr.bf16.mxu1 %v2123_v53  ;;  %1875 = vmatpush3.bf16.msra.mxu0 %v2139_v8  ;;  %v2153_v53 = vld [vmem:[#allocation8 + $0xb8] sm:$0xff]  }
 0x181   :  { %1876 = vmatprep.subr.bf16.mxu0 %v2140_v9 }
 0x183   :  { %1196 = vmatpush1.bf16.msra.mxu1 %v2121_v54 }
 0x184   :  { %1197 = vmatprep.subr.bf16.mxu1 %v2126_v55  ;;  %1877 = vmatpush3.bf16.msra.mxu0 %v2141_v10 }
 0x185   :  { %1878 = vmatprep.subr.bf16.mxu0 %v2142_v11 }
 0x187   :  { %1198 = vmatpush1.bf16.msra.mxu1 %v2124_v0 }
 0x188   :  { %1199 = vmatprep.subr.bf16.mxu1 %v2129_v56  ;;  %1879 = vmatpush3.bf16.msra.mxu0 %v2143_v12 }
 0x189   :  { %1880 = vmatprep.subr.bf16.mxu0 %v2144_v14 }
 0x18b   :  { %1200 = vmatpush1.bf16.msra.mxu1 %v2127_v57 }
 0x18c   :  { %1881 = vmatpush3.bf16.msra.mxu0 %v2145_v15 }
 0x18d   :  { %1923 = vmatprep.subr.bf16.mxu0 %v2283_v13 }
 0x18e   :  { %1218 = vmatmul.mubr.bf16.vlgmr.msra.gmra.mrb[4].mxu1 %v285_v42 }
 0x201   :  { %v1829_v16 = vpop.f32.mrb[8].mxu0 }
 0x202   :  { %v1830_v17 = vpop.f32.mrb[9].mxu0 }
 0x203   :  { %v1831_v18 = vadd.f32 %v1830_v17, %v1829_v16  ;;  %v1832_v19 = vpop.f32.mrb[10].mxu0 }
 0x204   :  { %v1833_v20 = vpop.f32.mrb[11].mxu0 }
 0x205   :  { %v1261_v25 = vadd.f32 %v1831_v18, %v459_v22 }
 0x221   :  { %v1851_v23 = vpop.f32.mrb[12].mxu0 }
 0x222   :  { %v1852_v24 = vpop.f32.mrb[13].mxu0 }
 0x223   :  { %v1853_v26 = vadd.f32 %v1852_v24, %v1851_v23  ;;  %v1854_v27 = vpop.f32.mrb[14].mxu0 }
 0x224   :  { %v1855_v28 = vpop.f32.mrb[15].mxu0 }
 0x225   :  { %v1301_v29 = vadd.f32 %v1853_v26, %v1261_v25 }
 0x241   :  { %v1340_v30 = vpop.f32.mrb[16].mxu0 }
 0x242   :  { %v1341_v31 = vadd.f32 %v1340_v30, %v1301_v29  ;;  %v1921_v32 = vpop.f32.mrb[17].mxu0 }
 0x243   :  { %v1343_v33 = vpop.f32.mrb[18].mxu0 }
 0x244   :  { %v1922_v35 = vpop.f32.mrb[19].mxu0  ;;  %v1351_v52 = vmul.f32 0.01, %v1341_v31  ;;  %vm1348_vm10 = vcmp.gt.f32.partialorder %v1341_v31, 0.0 }
 0x246   :  { %v1354_v54 = vsel %vm1348_vm10, %v1341_v31, %v1351_v52 }
 0x247   :  { %v1357_v55 = vpack.c.bf16 %v1354_v54, %v1354_v54 }
 0x261   :  { %v1219_v38 = vpop.f32.mrb[4].mxu1 }
 0x262   :  { %v1943_v49 = vadd.f32 %v1219_v38, %v451_v36  ;;  %v1221_v4 = vpop.f32.mrb[5].mxu1 }
 0x263   :  { %v1944_v39 = vadd.f32 %v1221_v4, %v455_v37  ;;  %v1223_v40 = vpop.f32.mrb[6].mxu1 }
 0x264   :  { %vm1346_vm8 = vcmp.gt.f32.partialorder %v1943_v49, 0.0  ;;  %v1349_v41 = vmul.f32 0.01, %v1943_v49  ;;  %v1224_v34 = vpop.f32.mrb[7].mxu1 }
 0x265   :  { %vm1347_vm9 = vcmp.gt.f32.partialorder %v1944_v39, 0.0  ;;  %v1350_v42 = vmul.f32 0.01, %v1944_v39 }
 0x266   :  { %v1352_v43 = vsel %vm1346_vm8, %v1943_v49, %v1349_v41 }
 0x267   :  { %v1353_v44 = vsel %vm1347_vm9, %v1944_v39, %v1350_v42  ;;  %v1355_v47 = vpack.c.bf16 %v1352_v43, %v1352_v43 }
 0x268   :  { %v1356_v45 = vpack.c.bf16 %v1353_v44, %v1353_v44 }
 0x26a   :  { %1589 = vmatprep.mubr.bf16.mxu0 %v1356_v45 }
 0x26b   :  { %1590 = vmatmul.mubr.bf16.vlgmr.msra.gmra.mrb[20].mxu0 %v1355_v47 }
 0x26c   :  { %1924 = vmatpush3.bf16.msra.mxu0 %v2146_v46  ;;  %1939 = vmatprep.mubr.msk.bf16.mxu0 %vm2284_vm2, %v2283_v13 }
 0x26d   :  { %1925 = vmatprep.subr.bf16.mxu0 %v2283_v13 }
 0x270   :  { %1926 = vmatpush3.bf16.msra.mxu0 %v2147_v2 }
 0x271   :  { %1927 = vmatprep.subr.bf16.mxu0 %v2283_v13 }
 0x274   :  { %1928 = vmatpush3.bf16.msra.mxu0 %v2148_v3 }
 0x275   :  { %1929 = vmatprep.subr.bf16.mxu0 %v2283_v13 }
 0x278   :  { %1930 = vmatpush3.bf16.msra.mxu0 %v2149_v5 }
 0x279   :  { %1931 = vmatprep.subr.bf16.mxu0 %v2283_v13 }
 0x27c   :  { %1932 = vmatpush3.bf16.msra.mxu0 %v2150_v48 }
 0x27d   :  { %1933 = vmatprep.subr.bf16.mxu0 %v2283_v13 }
 0x280   :  { %1934 = vmatpush3.bf16.msra.mxu0 %v2151_v50 }
 0x281   :  { %1935 = vmatprep.subr.bf16.mxu0 %v2283_v13 }
 0x284   :  { %1936 = vmatpush3.bf16.msra.mxu0 %v2152_v51 }
 0x285   :  { %1937 = vmatprep.subr.bf16.mxu0 %v2283_v13 }
 0x288   :  { %1938 = vmatpush3.bf16.msra.mxu0 %v2153_v53 }
 0x28b   :  { %1940 = vmatmul.mubr.bf16.vlgmr.msra.gmra.mrb[24].mxu0 %v1357_v55 }
 0x33e   :  { %v1882_v0 = vpop.f32.mrb[20].mxu0 }
 0x33f   :  { %v1883_v56 = vpop.f32.mrb[21].mxu0 }
 0x340   :  { %v1884_v57 = vadd.f32 %v1883_v56, %v1882_v0  ;;  %v1885_v58 = vpop.f32.mrb[22].mxu0 }
 0x341   :  { %v1886_v59 = vpop.f32.mrb[23].mxu0 }
 0x342   :  { %v1592_v61 = vadd.f32 %v1884_v57, %v1786_v60 }
 0x35e   :  { %v1631_v62 = vpop.f32.mrb[24].mxu0 }
 0x35f   :  { %v1632_v63 = vadd.f32 %v1631_v62, %v1592_v61  ;;  %v1941_v1 = vpop.f32.mrb[25].mxu0 }
 0x360   :  { %v1634_v6 = vpop.f32.mrb[26].mxu0 }
 0x361   :  { %2154 = vtanh.f32 %v1632_v63  ;;  %v1942_v13 = vpop.f32.mrb[27].mxu0 }
 0x36b   :  { %v2155_v7 = vpop.eup %2154 }
 0x36c   :  { %1638 = vst [vmem:[#allocation10] sm:$0xff] %v2155_v7 }
 0x36d   :  { %2255 = shalt.err (!%p2252_p8)
}
 0x36e   :  { %s2256_s11 = scalar_lea.hbm %s2472_s7, 128 }
 0x36f   :  { %p2257_p9 = scmp.ne.s32.totalorder %s2472_s7, %s2256_s11  ;;  %p2260_p10 = scmp.lt.u32.totalorder %s2256_s11, %s2472_s7 }
 0x371   :  { %p2262_p11 = pnand %p2260_p10, %p2257_p9 }
 0x373   :  { %2265 = shalt.err (!%p2262_p11)
}
 0x374   :  { %1648 = dma.vmem_to_hbm [thread:$0]  %s1646_s8, 128, %s2472_s7, [#allocation4]  }
 0x375   :  { %2272 = dma.done.wait [#allocation4], 128  }
 0x376   :  { %2273 = vsyncadd [#allocation4], 4294967168 }
 0x377   :  { %1652 = vsyncpa [#allocation3], 1 }
 0x378   :  { %1653 = vsyncpa [#allocation6], 1 }
 0x379   :  { %1654 = vsyncpa [#allocation9], 1 }
 0x37a   :  { %1655 = vsyncpa [#allocation4], 1 }

</bundles_post_ra>
